<compile_context>
chip_gen: v7x
topology: tpu7x:2x2x1
jax: 0.10.0
libtpu: 0.0.40
codegen_flags: <defaults>
</compile_context>

<pallas_src>
import functools

import jax
import jax.numpy as jnp
from jax.experimental import pallas as pl
from jax.experimental.pallas import tpu as pltpu

IN_FEATURES = 28 * 28  # 784
H1 = 512
H2 = 256
OUT = 1


def _round_up(n, m):
    return ((n + m - 1) // m) * m


def _disc_kernel(x_ref, w1_ref, b1_ref, w2_ref, b2_ref, w3_ref, b3_ref, o_ref):
    # x, w1, w2 are bf16; MXU matmuls accumulate in f32.
    x = x_ref[...]

    # Linear(784 -> 512) + LeakyReLU(0.2)  (max form: 2 VALU ops/elem)
    h1 = jnp.dot(x, w1_ref[...], preferred_element_type=jnp.float32) + b1_ref[...]
    h1 = jnp.maximum(h1, 0.2 * h1)

    # Linear(512 -> 256) + LeakyReLU(0.2)
    h2 = (
        jnp.dot(h1.astype(jnp.bfloat16), w2_ref[...], preferred_element_type=jnp.float32)
        + b2_ref[...]
    )
    h2 = jnp.maximum(h2, 0.2 * h2)

    # Linear(256 -> 1): N=1 would waste a full MXU pass, so do a VPU broadcast
    # multiply + XLU lane reduction instead. w3_ref holds the weight row (1, 256).
    logits = jnp.sum(h2 * w3_ref[...], axis=-1, keepdims=True) + b3_ref[...]

    # Sigmoid: exp + approx reciprocal on the EUP (off the VALU/MXU critical path).
    o_ref[...] = pl.reciprocal(1.0 + jnp.exp(-logits), approx=True).astype(o_ref.dtype)


def _resident_spec(shape):
    """Whole-array VMEM-resident spec (constant index_map), single-buffered."""
    index_map = lambda i, _n=len(shape): (0,) * _n
    try:
        # Constant blocks are never re-fetched; one buffer saves ~1-2 MiB of VMEM.
        return pl.BlockSpec(shape, index_map, pipeline_mode=pl.Buffered(1))
    except (TypeError, AttributeError):
        # Older jax without pipeline_mode / pl.Buffered: default buffering.
        return pl.BlockSpec(shape, index_map)


@functools.partial(jax.jit, static_argnames=("batch_tile",))
def discriminator_forward(x, params, *, batch_tile=2048):
    """x: (B, 784) float32; params: (in,out)-layout weights and (1,out) biases."""
    B, F = x.shape
    assert F == IN_FEATURES

    # x is bf16 -> keep tiles / padding at multiples of 16 sublanes.
    bt = min(batch_tile, _round_up(B, 16))
    # v7x has 2 TensorCores: when the batch is big enough to split, cap the tile so
    # the "parallel" grid axis has >= 2 steps (otherwise one core idles).
    if B >= 512:
        half = -(-_round_up(B, 16) // 2)          # cdiv(padded B, 2)
        bt = min(bt, _round_up(half, 256))
    Bp = _round_up(B, bt)

    x_bf16 = x.astype(jnp.bfloat16)
    if Bp != B:
        x_bf16 = jnp.pad(x_bf16, ((0, Bp - B), (0, 0)))

    w1 = params["w1"].astype(jnp.bfloat16)
    w2 = params["w2"].astype(jnp.bfloat16)
    b1 = params["b1"].astype(jnp.float32)
    b2 = params["b2"].astype(jnp.float32)
    # Final layer is tiny: keep it f32, stored as a (1, H2) row for the VPU path.
    w3 = params["w3"].reshape(1, H2).astype(jnp.float32)
    b3 = params["b3"].reshape(1, OUT).astype(jnp.float32)

    grid = (Bp // bt,)

    out = pl.pallas_call(
        _disc_kernel,
        out_shape=jax.ShapeDtypeStruct((Bp, OUT), jnp.float32),
        grid_spec=pltpu.PrefetchScalarGridSpec(
            num_scalar_prefetch=0,
            grid=grid,
            in_specs=[
                pl.BlockSpec((bt, IN_FEATURES), lambda i: (i, 0)),  # x: tiled on batch
                _resident_spec((IN_FEATURES, H1)),                  # w1
                _resident_spec((1, H1)),                            # b1
                _resident_spec((H1, H2)),                           # w2
                _resident_spec((1, H2)),                            # b2
                _resident_spec((1, H2)),                            # w3 row
                _resident_spec((1, OUT)),                           # b3
            ],
            out_specs=pl.BlockSpec((bt, OUT), lambda i: (i, 0)),
        ),
        compiler_params=pltpu.CompilerParams(
            dimension_semantics=("parallel",),
        ),
    )(x_bf16, w1, b1, w2, b2, w3, b3)

    return out[:B]


def init_params(key):
    """Deterministic init mimicking PyTorch nn.Linear default (U(-1/sqrt(fan_in), +))."""
    def linear(k, fan_in, fan_out):
        kw, kb = jax.random.split(k)
        bound = 1.0 / (fan_in ** 0.5)
        w = jax.random.uniform(kw, (fan_in, fan_out), jnp.float32, -bound, bound)
        b = jax.random.uniform(kb, (1, fan_out), jnp.float32, -bound, bound)
        return w, b

    k1, k2, k3 = jax.random.split(key, 3)
    w1, b1 = linear(k1, IN_FEATURES, H1)
    w2, b2 = linear(k2, H1, H2)
    w3, b3 = linear(k3, H2, OUT)
    return {"w1": w1, "b1": b1, "w2": w2, "b2": b2, "w3": w3, "b3": b3}


def _reference(x, p):
    """Pure-JAX fp32 reference of the PyTorch forward."""
    def lrelu(v):
        return jnp.where(v > 0, v, 0.2 * v)

    h = lrelu(x @ p["w1"] + p["b1"])
    h = lrelu(h @ p["w2"] + p["b2"])
    return jax.nn.sigmoid(h @ p["w3"] + p["b3"])


if __name__ == "__main__":
    key = jax.random.PRNGKey(0)
    kx, kp = jax.random.split(key)

    params = init_params(kp)

    # Small demo batch of flattened 28x28 "images" (single-tile path).
    B = 16
    x = jax.random.normal(kx, (B, IN_FEATURES), jnp.float32)
    out = jax.block_until_ready(discriminator_forward(x, params))
    ref = _reference(x, params)
    assert out.shape == (B, OUT)
    # bf16 matmuls with f32 accumulation -> compare against the fp32 reference loosely.
    assert jnp.allclose(out, ref, atol=2e-2, rtol=2e-2), "mismatch vs JAX reference"

    # Multi-tile grid + batch-padding path.
    B2 = 300
    x2 = jax.random.normal(kx, (B2, IN_FEATURES), jnp.float32)
    out2 = jax.block_until_ready(discriminator_forward(x2, params, batch_tile=128))
    ref2 = _reference(x2, params)
    assert out2.shape == (B2, OUT)
    assert jnp.allclose(out2, ref2, atol=2e-2, rtol=2e-2), "mismatch vs JAX reference (tiled)"

    # Default tile with the >=2-grid-step split (dual-TensorCore path on v7x).
    B3 = 520
    x3 = jax.random.normal(kx, (B3, IN_FEATURES), jnp.float32)
    out3 = jax.block_until_ready(discriminator_forward(x3, params))
    ref3 = _reference(x3, params)
    assert out3.shape == (B3, OUT)
    assert jnp.allclose(out3, ref3, atol=2e-2, rtol=2e-2), "mismatch vs JAX reference (split)"

    print("KERNEL_OK")
</pallas_src>

<mosaic_0001>
module attributes {stable_mosaic.version = 11 : i64} {
  func.func @_disc_kernel(%arg0: i32, %arg1: memref<16x784xbf16, #tpu.memory_space<vmem>>, %arg2: memref<784x512xbf16, #tpu.memory_space<vmem>>, %arg3: memref<1x512xf32, #tpu.memory_space<vmem>>, %arg4: memref<512x256xbf16, #tpu.memory_space<vmem>>, %arg5: memref<1x256xf32, #tpu.memory_space<vmem>>, %arg6: memref<1x256xf32, #tpu.memory_space<vmem>>, %arg7: memref<1x1xf32, #tpu.memory_space<vmem>>, %arg8: memref<16x1xf32, #tpu.memory_space<vmem>>) attributes {dimension_semantics = [#tpu.dimension_semantics<parallel>], iteration_bounds = array<i64: 1>, scalar_prefetch = 0 : i64, scratch_operands = 0 : i64, tpu.core_type = #tpu.core_type<tc>, window_params = [{transform_indices = @transform_0, window_bounds = array<i64: 16, 784>}, {pipeline_mode = #tpu.pipeline_mode<synchronous>, transform_indices = @transform_1, window_bounds = array<i64: 784, 512>}, {pipeline_mode = #tpu.pipeline_mode<synchronous>, transform_indices = @transform_2, window_bounds = array<i64: 1, 512>}, {pipeline_mode = #tpu.pipeline_mode<synchronous>, transform_indices = @transform_3, window_bounds = array<i64: 512, 256>}, {pipeline_mode = #tpu.pipeline_mode<synchronous>, transform_indices = @transform_4, window_bounds = array<i64: 1, 256>}, {pipeline_mode = #tpu.pipeline_mode<synchronous>, transform_indices = @transform_5, window_bounds = array<i64: 1, 256>}, {pipeline_mode = #tpu.pipeline_mode<synchronous>, transform_indices = @transform_6, window_bounds = array<i64: 1, 1>}, {transform_indices = @transform_7, window_bounds = array<i64: 16, 1>}]} {
    %c0 = arith.constant 0 : index
    %c0_0 = arith.constant 0 : index
    %0 = vector.load %arg1[%c0, %c0_0] : memref<16x784xbf16, #tpu.memory_space<vmem>>, vector<16x784xbf16>
    %c0_1 = arith.constant 0 : index
    %c0_2 = arith.constant 0 : index
    %1 = vector.load %arg2[%c0_1, %c0_2] : memref<784x512xbf16, #tpu.memory_space<vmem>>, vector<784x512xbf16>
    %cst = arith.constant dense<0.000000e+00> : vector<16x512xf32>
    %2 = tpu.matmul %0, %1, %cst {dimension_numbers = #tpu.dot_dimension_numbers<[1], [0], [0], [1], [0, 0, 1, 1], [], []>} : vector<16x784xbf16>, vector<784x512xbf16>, vector<16x512xf32> -> vector<16x512xf32>
    %c0_3 = arith.constant 0 : index
    %c0_4 = arith.constant 0 : index
    %3 = vector.load %arg3[%c0_3, %c0_4] : memref<1x512xf32, #tpu.memory_space<vmem>>, vector<1x512xf32>
    %4 = vector.broadcast %3 : vector<1x512xf32> to vector<16x512xf32>
    %5 = arith.addf %2, %4 : vector<16x512xf32>
    %cst_5 = arith.constant 2.000000e-01 : f32
    %6 = vector.broadcast %cst_5 : f32 to vector<16x512xf32>
    %7 = arith.mulf %6, %5 : vector<16x512xf32>
    %8 = arith.maximumf %5, %7 : vector<16x512xf32>
    %9 = arith.truncf %8 : vector<16x512xf32> to vector<16x512xbf16>
    %c0_6 = arith.constant 0 : index
    %c0_7 = arith.constant 0 : index
    %10 = vector.load %arg4[%c0_6, %c0_7] : memref<512x256xbf16, #tpu.memory_space<vmem>>, vector<512x256xbf16>
    %cst_8 = arith.constant dense<0.000000e+00> : vector<16x256xf32>
    %11 = tpu.matmul %9, %10, %cst_8 {dimension_numbers = #tpu.dot_dimension_numbers<[1], [0], [0], [1], [0, 0, 1, 1], [], []>} : vector<16x512xbf16>, vector<512x256xbf16>, vector<16x256xf32> -> vector<16x256xf32>
    %c0_9 = arith.constant 0 : index
    %c0_10 = arith.constant 0 : index
    %12 = vector.load %arg5[%c0_9, %c0_10] : memref<1x256xf32, #tpu.memory_space<vmem>>, vector<1x256xf32>
    %13 = vector.broadcast %12 : vector<1x256xf32> to vector<16x256xf32>
    %14 = arith.addf %11, %13 : vector<16x256xf32>
    %cst_11 = arith.constant 2.000000e-01 : f32
    %15 = vector.broadcast %cst_11 : f32 to vector<16x256xf32>
    %16 = arith.mulf %15, %14 : vector<16x256xf32>
    %17 = arith.maximumf %14, %16 : vector<16x256xf32>
    %c0_12 = arith.constant 0 : index
    %c0_13 = arith.constant 0 : index
    %18 = vector.load %arg6[%c0_12, %c0_13] : memref<1x256xf32, #tpu.memory_space<vmem>>, vector<1x256xf32>
    %19 = vector.broadcast %18 : vector<1x256xf32> to vector<16x256xf32>
    %20 = arith.mulf %17, %19 : vector<16x256xf32>
    %cst_14 = arith.constant dense<0.000000e+00> : vector<16xf32>
    %21 = vector.multi_reduction <add>, %20, %cst_14 [1] : vector<16x256xf32> to vector<16xf32>
    %22 = vector.shape_cast %21 : vector<16xf32> to vector<16x1xf32>
    %c0_15 = arith.constant 0 : index
    %c0_16 = arith.constant 0 : index
    %23 = vector.load %arg7[%c0_15, %c0_16] : memref<1x1xf32, #tpu.memory_space<vmem>>, vector<1x1xf32>
    %24 = vector.broadcast %23 : vector<1x1xf32> to vector<16x1xf32>
    %25 = arith.addf %22, %24 : vector<16x1xf32>
    %cst_17 = arith.constant 0.000000e+00 : f32
    %26 = vector.broadcast %cst_17 : f32 to vector<16x1xf32>
    %27 = arith.subf %26, %25 : vector<16x1xf32>
    %28 = math.exp %27 : vector<16x1xf32>
    %cst_18 = arith.constant 1.000000e+00 : f32
    %29 = vector.broadcast %cst_18 : f32 to vector<16x1xf32>
    %30 = arith.addf %29, %28 : vector<16x1xf32>
    %31 = tpu.reciprocal %30 {approx = true} : vector<16x1xf32> -> vector<16x1xf32>
    %c0_19 = arith.constant 0 : index
    %c0_20 = arith.constant 0 : index
    %32 = vector.load %arg8[%c0_19, %c0_20] : memref<16x1xf32, #tpu.memory_space<vmem>>, vector<16x1xf32>
    tpu.vector_store %arg8[%c0_19, %c0_20], %31 {strides = array<i32>} : memref<16x1xf32, #tpu.memory_space<vmem>>, vector<16x1xf32>,
    return
  }
  func.func @transform_0(%arg0: i32) -> (i32, i32) {
    %c0_i32 = arith.constant 0 : i32
    %c0_i32_0 = arith.constant 0 : i32
    return %arg0, %c0_i32 : i32, i32
  }
  func.func @transform_1(%arg0: i32) -> (i32, i32) {
    %c0_i32 = arith.constant 0 : i32
    %c0_i32_0 = arith.constant 0 : i32
    %c0_i32_1 = arith.constant 0 : i32
    return %c0_i32, %c0_i32_0 : i32, i32
  }
  func.func @transform_2(%arg0: i32) -> (i32, i32) {
    %c0_i32 = arith.constant 0 : i32
    %c0_i32_0 = arith.constant 0 : i32
    %c0_i32_1 = arith.constant 0 : i32
    return %c0_i32, %c0_i32_0 : i32, i32
  }
  func.func @transform_3(%arg0: i32) -> (i32, i32) {
    %c0_i32 = arith.constant 0 : i32
    %c0_i32_0 = arith.constant 0 : i32
    %c0_i32_1 = arith.constant 0 : i32
    return %c0_i32, %c0_i32_0 : i32, i32
  }
  func.func @transform_4(%arg0: i32) -> (i32, i32) {
    %c0_i32 = arith.constant 0 : i32
    %c0_i32_0 = arith.constant 0 : i32
    %c0_i32_1 = arith.constant 0 : i32
    return %c0_i32, %c0_i32_0 : i32, i32
  }
  func.func @transform_5(%arg0: i32) -> (i32, i32) {
    %c0_i32 = arith.constant 0 : i32
    %c0_i32_0 = arith.constant 0 : i32
    %c0_i32_1 = arith.constant 0 : i32
    return %c0_i32, %c0_i32_0 : i32, i32
  }
  func.func @transform_6(%arg0: i32) -> (i32, i32) {
    %c0_i32 = arith.constant 0 : i32
    %c0_i32_0 = arith.constant 0 : i32
    %c0_i32_1 = arith.constant 0 : i32
    return %c0_i32, %c0_i32_0 : i32, i32
  }
  func.func @transform_7(%arg0: i32) -> (i32, i32) {
    %c0_i32 = arith.constant 0 : i32
    %c0_i32_0 = arith.constant 0 : i32
    return %arg0, %c0_i32 : i32, i32
  }
}

</mosaic_0001>

<bundles_post_ra>
// kernel: discriminator_forward.1
= control target key start
LH: loop header
LB: loop body
LE: loop exit
PB: predicated region body
PF: predicated region fallthrough
CT: control target
= control target key end

     0   :  { %vm1270_vm0 = vcmask 130048   ;;  %vm2169_vm1 = vcmask 7168   ;;  %s3805_s1 = inlined_call_operand.vmem [shape: bf16[784,512], index: 1, kind: input, shape index: {}]   ;;  %s3806_s0 = inlined_call_operand.vmem [shape: bf16[16,784], index: 0, kind: input, shape index: {}]   ;;  %s3807_s3 = inlined_call_operand.vmem [shape: bf16[512,256], index: 3, kind: input, shape index: {}]   ;;  %s3808_s2 = inlined_call_operand.vmem [shape: f32[1,512], index: 2, kind: input, shape index: {}]   ;;  %s3809_s6 = inlined_call_operand.<no memory space> [shape: f32[1,1], index: 6, kind: input, shape index: {}]   ;;  %s3810_s4 = inlined_call_operand.vmem [shape: f32[1,256], index: 4, kind: input, shape index: {}]   ;;  %s3811_s5 = inlined_call_operand.vmem [shape: f32[1,256], index: 5, kind: input, shape index: {}]   ;;  %s3812_s7 = inlined_call_operand.vmem [shape: f32[16,1], index: 7, kind: output, shape index: {}]  }
   0x1   :  { %v2487_v0 = vld [vmem:[%s3805_s1 + $0x4] ss:$16 sps:$4 sm:$0xff]   ;;  %v2491_v2 = vld [vmem:[%s3805_s1] ss:$16 sps:$4 sm:$0xff]   ;;  %v3092_v51 = vld [vmem:[%s3806_s0 + $0xc] ss:$28 sps:$4 sm:$0xff]  }
   0x2   :  { %v2489_v1 = vld [vmem:[%s3805_s1 + $0x204] ss:$16 sps:$4 sm:$0xff]   ;;  %1274 = vmatprep.subr.bf16.mxu1 %v2487_v0  ;;  %v2492_v3 = vld [vmem:[%s3805_s1 + $0x200] ss:$16 sps:$4 sm:$0xff]   ;;  %1349 = vmatprep.mubr.bf16.mxu0 %v3092_v51 }
   0x3   :  { %1317 = vmatprep.subr.bf16.mxu0 %v2489_v1  ;;  %v2493_v4 = vld [vmem:[%s3805_s1 + $0x24] ss:$16 sps:$4 sm:$0xff]   ;;  %1275 = vmatpush1.bf16.msra.mxu1 %v2491_v2  ;;  %v2497_v6 = vld [vmem:[%s3805_s1 + $0x20] ss:$16 sps:$4 sm:$0xff]  }
   0x4   :  { %1318 = vmatpush1.bf16.msra.mxu0 %v2492_v3  ;;  %v2495_v5 = vld [vmem:[%s3805_s1 + $0x224] ss:$16 sps:$4 sm:$0xff]   ;;  %1276 = vmatprep.subr.bf16.mxu1 %v2493_v4  ;;  %v2498_v7 = vld [vmem:[%s3805_s1 + $0x220] ss:$16 sps:$4 sm:$0xff]   ;;  %v2594_v3 = vld [vmem:[%s3805_s1 + $0xc] ss:$16 sps:$4 sm:$0xff]  }
   0x5   :  { %1319 = vmatprep.subr.bf16.mxu0 %v2495_v5  ;;  %v2499_v8 = vld [vmem:[%s3805_s1 + $0x44] ss:$16 sps:$4 sm:$0xff]   ;;  %v2503_v10 = vld [vmem:[%s3805_s1 + $0x40] ss:$16 sps:$4 sm:$0xff]  }
   0x6   :  { %v2501_v9 = vld [vmem:[%s3805_s1 + $0x244] ss:$16 sps:$4 sm:$0xff]   ;;  %v2504_v11 = vld [vmem:[%s3805_s1 + $0x240] ss:$16 sps:$4 sm:$0xff]  }
   0x7   :  { %1277 = vmatpush1.bf16.msra.mxu1 %v2497_v6  ;;  %v2505_v12 = vld [vmem:[%s3805_s1 + $0x64] ss:$16 sps:$4 sm:$0xff]   ;;  %v2509_v14 = vld [vmem:[%s3805_s1 + $0x60] ss:$16 sps:$4 sm:$0xff]  }
   0x8   :  { %1320 = vmatpush1.bf16.msra.mxu0 %v2498_v7  ;;  %1278 = vmatprep.subr.bf16.mxu1 %v2499_v8  ;;  %v2507_v13 = vld [vmem:[%s3805_s1 + $0x264] ss:$16 sps:$4 sm:$0xff]   ;;  %v2510_v15 = vld [vmem:[%s3805_s1 + $0x260] ss:$16 sps:$4 sm:$0xff]   ;;  %v2592_v7 = vld [vmem:[%s3805_s1 + $0x8] ss:$16 sps:$4 sm:$0xff]  }
   0x9   :  { %1321 = vmatprep.subr.bf16.mxu0 %v2501_v9  ;;  %v2511_v16 = vld [vmem:[%s3805_s1 + $0x84] ss:$16 sps:$4 sm:$0xff]   ;;  %v2515_v18 = vld [vmem:[%s3805_s1 + $0x80] ss:$16 sps:$4 sm:$0xff]   ;;  %v2600_v9 = vld [vmem:[%s3805_s1 + $0x2c] ss:$16 sps:$4 sm:$0xff]  }
   0xa   :  { %v2513_v17 = vld [vmem:[%s3805_s1 + $0x284] ss:$16 sps:$4 sm:$0xff]   ;;  %v2516_v19 = vld [vmem:[%s3805_s1 + $0x280] ss:$16 sps:$4 sm:$0xff]  }
   0xb   :  { %1279 = vmatpush1.bf16.msra.mxu1 %v2503_v10  ;;  %v2517_v20 = vld [vmem:[%s3805_s1 + $0xa4] ss:$16 sps:$4 sm:$0xff]   ;;  %v2521_v22 = vld [vmem:[%s3805_s1 + $0xa0] ss:$16 sps:$4 sm:$0xff]  }
   0xc   :  { %1322 = vmatpush1.bf16.msra.mxu0 %v2504_v11  ;;  %1280 = vmatprep.subr.bf16.mxu1 %v2505_v12  ;;  %v2519_v21 = vld [vmem:[%s3805_s1 + $0x2a4] ss:$16 sps:$4 sm:$0xff]   ;;  %v2522_v23 = vld [vmem:[%s3805_s1 + $0x2a0] ss:$16 sps:$4 sm:$0xff]   ;;  %v2598_v11 = vld [vmem:[%s3805_s1 + $0x28] ss:$16 sps:$4 sm:$0xff]  }
   0xd   :  { %1323 = vmatprep.subr.bf16.mxu0 %v2507_v13  ;;  %v2523_v24 = vld [vmem:[%s3805_s1 + $0xc4] ss:$16 sps:$4 sm:$0xff]   ;;  %v2527_v26 = vld [vmem:[%s3805_s1 + $0xc0] ss:$16 sps:$4 sm:$0xff]   ;;  %v2606_v13 = vld [vmem:[%s3805_s1 + $0x4c] ss:$16 sps:$4 sm:$0xff]  }
   0xe   :  { %v2525_v25 = vld [vmem:[%s3805_s1 + $0x2c4] ss:$16 sps:$4 sm:$0xff]   ;;  %v2528_v27 = vld [vmem:[%s3805_s1 + $0x2c0] ss:$16 sps:$4 sm:$0xff]  }
   0xf   :  { %1281 = vmatpush1.bf16.msra.mxu1 %v2509_v14  ;;  %v2529_v28 = vld [vmem:[%s3805_s1 + $0xe4] ss:$16 sps:$4 sm:$0xff]   ;;  %v2533_v30 = vld [vmem:[%s3805_s1 + $0xe0] ss:$16 sps:$4 sm:$0xff]  }
  0x10   :  { %1324 = vmatpush1.bf16.msra.mxu0 %v2510_v15  ;;  %1282 = vmatprep.subr.bf16.mxu1 %v2511_v16  ;;  %v2531_v29 = vld [vmem:[%s3805_s1 + $0x2e4] ss:$16 sps:$4 sm:$0xff]   ;;  %v2534_v31 = vld [vmem:[%s3805_s1 + $0x2e0] ss:$16 sps:$4 sm:$0xff]   ;;  %v2604_v15 = vld [vmem:[%s3805_s1 + $0x48] ss:$16 sps:$4 sm:$0xff]  }
  0x11   :  { %1325 = vmatprep.subr.bf16.mxu0 %v2513_v17  ;;  %v2535_v32 = vld [vmem:[%s3805_s1 + $0x104] ss:$16 sps:$4 sm:$0xff]   ;;  %v2539_v34 = vld [vmem:[%s3805_s1 + $0x100] ss:$16 sps:$4 sm:$0xff]   ;;  %v2612_v17 = vld [vmem:[%s3805_s1 + $0x6c] ss:$16 sps:$4 sm:$0xff]  }
  0x12   :  { %v2537_v33 = vld [vmem:[%s3805_s1 + $0x304] ss:$16 sps:$4 sm:$0xff]   ;;  %v2540_v35 = vld [vmem:[%s3805_s1 + $0x300] ss:$16 sps:$4 sm:$0xff]  }
  0x13   :  { %1283 = vmatpush1.bf16.msra.mxu1 %v2515_v18  ;;  %v2541_v36 = vld [vmem:[%s3805_s1 + $0x124] ss:$16 sps:$4 sm:$0xff]   ;;  %v2545_v38 = vld [vmem:[%s3805_s1 + $0x120] ss:$16 sps:$4 sm:$0xff]  }
  0x14   :  { %1326 = vmatpush1.bf16.msra.mxu0 %v2516_v19  ;;  %1284 = vmatprep.subr.bf16.mxu1 %v2517_v20  ;;  %v2543_v37 = vld [vmem:[%s3805_s1 + $0x324] ss:$16 sps:$4 sm:$0xff]   ;;  %v2546_v39 = vld [vmem:[%s3805_s1 + $0x320] ss:$16 sps:$4 sm:$0xff]   ;;  %v2610_v19 = vld [vmem:[%s3805_s1 + $0x68] ss:$16 sps:$4 sm:$0xff]  }
  0x15   :  { %1327 = vmatprep.subr.bf16.mxu0 %v2519_v21  ;;  %v2547_v40 = vld [vmem:[%s3805_s1 + $0x144] ss:$16 sps:$4 sm:$0xff]   ;;  %v2551_v42 = vld [vmem:[%s3805_s1 + $0x140] ss:$16 sps:$4 sm:$0xff]   ;;  %v2618_v21 = vld [vmem:[%s3805_s1 + $0x8c] ss:$16 sps:$4 sm:$0xff]  }
  0x16   :  { %v2549_v41 = vld [vmem:[%s3805_s1 + $0x344] ss:$16 sps:$4 sm:$0xff]   ;;  %v2552_v43 = vld [vmem:[%s3805_s1 + $0x340] ss:$16 sps:$4 sm:$0xff]  }
  0x17   :  { %1285 = vmatpush1.bf16.msra.mxu1 %v2521_v22  ;;  %v2553_v44 = vld [vmem:[%s3805_s1 + $0x164] ss:$16 sps:$4 sm:$0xff]   ;;  %v2557_v46 = vld [vmem:[%s3805_s1 + $0x160] ss:$16 sps:$4 sm:$0xff]  }
  0x18   :  { %1328 = vmatpush1.bf16.msra.mxu0 %v2522_v23  ;;  %1286 = vmatprep.subr.bf16.mxu1 %v2523_v24  ;;  %v2555_v45 = vld [vmem:[%s3805_s1 + $0x364] ss:$16 sps:$4 sm:$0xff]   ;;  %v2558_v47 = vld [vmem:[%s3805_s1 + $0x360] ss:$16 sps:$4 sm:$0xff]   ;;  %v2616_v23 = vld [vmem:[%s3805_s1 + $0x88] ss:$16 sps:$4 sm:$0xff]  }
  0x19   :  { %1329 = vmatprep.subr.bf16.mxu0 %v2525_v25  ;;  %v2559_v48 = vld [vmem:[%s3805_s1 + $0x184] ss:$16 sps:$4 sm:$0xff]   ;;  %v2563_v52 = vld [vmem:[%s3805_s1 + $0x180] ss:$16 sps:$4 sm:$0xff]   ;;  %v2624_v25 = vld [vmem:[%s3805_s1 + $0xac] ss:$16 sps:$4 sm:$0xff]  }
  0x1a   :  { %v2585_v49 = vld [vmem:[%s3806_s0 + $0x4] ss:$28 sps:$4 sm:$0xff]  }
  0x1b   :  { %1287 = vmatpush1.bf16.msra.mxu1 %v2527_v26  ;;  %v2561_v50 = vld [vmem:[%s3805_s1 + $0x384] ss:$16 sps:$4 sm:$0xff]   ;;  %1306 = vmatprep.mubr.bf16.mxu1 %v2585_v49  ;;  %v2564_v53 = vld [vmem:[%s3805_s1 + $0x380] ss:$16 sps:$4 sm:$0xff]  }
  0x1c   :  { %1330 = vmatpush1.bf16.msra.mxu0 %v2528_v27  ;;  %1288 = vmatprep.subr.bf16.mxu1 %v2529_v28  ;;  %v2565_v54 = vld [vmem:[%s3805_s1 + $0x1a4] ss:$16 sps:$4 sm:$0xff]   ;;  %v2569_v56 = vld [vmem:[%s3805_s1 + $0x1a0] ss:$16 sps:$4 sm:$0xff]   ;;  %v2622_v27 = vld [vmem:[%s3805_s1 + $0xa8] ss:$16 sps:$4 sm:$0xff]  }
  0x1d   :  { %1331 = vmatprep.subr.bf16.mxu0 %v2531_v29  ;;  %v2567_v55 = vld [vmem:[%s3805_s1 + $0x3a4] ss:$16 sps:$4 sm:$0xff]   ;;  %v2570_v57 = vld [vmem:[%s3805_s1 + $0x3a0] ss:$16 sps:$4 sm:$0xff]   ;;  %v2630_v29 = vld [vmem:[%s3805_s1 + $0xcc] ss:$16 sps:$4 sm:$0xff]  }
  0x1e   :  { %v2571_v58 = vld [vmem:[%s3805_s1 + $0x1c4] ss:$16 sps:$4 sm:$0xff]   ;;  %v2575_v60 = vld [vmem:[%s3805_s1 + $0x1c0] ss:$16 sps:$4 sm:$0xff]  }
  0x1f   :  { %1289 = vmatpush1.bf16.msra.mxu1 %v2533_v30  ;;  %v2573_v59 = vld [vmem:[%s3805_s1 + $0x3c4] ss:$16 sps:$4 sm:$0xff]   ;;  %v2576_v61 = vld [vmem:[%s3805_s1 + $0x3c0] ss:$16 sps:$4 sm:$0xff]  }
  0x20   :  { %1332 = vmatpush1.bf16.msra.mxu0 %v2534_v31  ;;  %1290 = vmatprep.subr.bf16.mxu1 %v2535_v32  ;;  %v2577_v62 = vld [vmem:[%s3805_s1 + $0x1e4] ss:$16 sps:$4 sm:$0xff]   ;;  %v2581_v0 = vld [vmem:[%s3805_s1 + $0x1e0] ss:$16 sps:$4 sm:$0xff]   ;;  %v2628_v31 = vld [vmem:[%s3805_s1 + $0xc8] ss:$16 sps:$4 sm:$0xff]  }
  0x21   :  { %1333 = vmatprep.subr.bf16.mxu0 %v2537_v33  ;;  %v2579_v63 = vld [vmem:[%s3805_s1 + $0x3e4] ss:$16 sps:$4 sm:$0xff]   ;;  %v2582_v1 = vld [vmem:[%s3805_s1 + $0x3e0] ss:$16 sps:$4 sm:$0xff]   ;;  %v2636_v33 = vld [vmem:[%s3805_s1 + $0xec] ss:$16 sps:$4 sm:$0xff]  }
  0x22   :  { %v2591_v2 = vld [vmem:[%s3805_s1 + $0x404] ss:$16 sps:$4 sm:$0xff]   ;;  %v3146_v4 = vld [vmem:[%s3806_s0] ss:$28 sps:$4 sm:$0xff]  }
  0x23   :  { %1291 = vmatpush1.bf16.msra.mxu1 %v2539_v34  ;;  %v3151_v5 = vld [vmem:[%s3806_s0 + $0x8] ss:$28 sps:$4 sm:$0xff]   ;;  %v2589_v6 = vld [vmem:[%s3805_s1 + $0x400] ss:$16 sps:$4 sm:$0xff]  }
  0x24   :  { %1334 = vmatpush1.bf16.msra.mxu0 %v2540_v35  ;;  %1292 = vmatprep.subr.bf16.mxu1 %v2541_v36  ;;  %v2597_v8 = vld [vmem:[%s3805_s1 + $0x424] ss:$16 sps:$4 sm:$0xff]   ;;  %v2595_v10 = vld [vmem:[%s3805_s1 + $0x420] ss:$16 sps:$4 sm:$0xff]   ;;  %v2634_v36 = vld [vmem:[%s3805_s1 + $0xe8] ss:$16 sps:$4 sm:$0xff]  }
  0x25   :  { %1335 = vmatprep.subr.bf16.mxu0 %v2543_v37  ;;  %v2603_v12 = vld [vmem:[%s3805_s1 + $0x444] ss:$16 sps:$4 sm:$0xff]   ;;  %v2601_v14 = vld [vmem:[%s3805_s1 + $0x440] ss:$16 sps:$4 sm:$0xff]  }
  0x26   :  { %v2609_v16 = vld [vmem:[%s3805_s1 + $0x464] ss:$16 sps:$4 sm:$0xff]   ;;  %v2607_v18 = vld [vmem:[%s3805_s1 + $0x460] ss:$16 sps:$4 sm:$0xff]  }
  0x27   :  { %1293 = vmatpush1.bf16.msra.mxu1 %v2545_v38  ;;  %v2615_v20 = vld [vmem:[%s3805_s1 + $0x484] ss:$16 sps:$4 sm:$0xff]   ;;  %v2613_v22 = vld [vmem:[%s3805_s1 + $0x480] ss:$16 sps:$4 sm:$0xff]   ;;  %v2642_v38 = vld [vmem:[%s3805_s1 + $0x10c] ss:$16 sps:$4 sm:$0xff]  }
  0x28   :  { %1336 = vmatpush1.bf16.msra.mxu0 %v2546_v39  ;;  %1294 = vmatprep.subr.bf16.mxu1 %v2547_v40  ;;  %v2621_v24 = vld [vmem:[%s3805_s1 + $0x4a4] ss:$16 sps:$4 sm:$0xff]   ;;  %v2619_v26 = vld [vmem:[%s3805_s1 + $0x4a0] ss:$16 sps:$4 sm:$0xff]   ;;  %v2640_v40 = vld [vmem:[%s3805_s1 + $0x108] ss:$16 sps:$4 sm:$0xff]  }
  0x29   :  { %1337 = vmatprep.subr.bf16.mxu0 %v2549_v41  ;;  %v2627_v28 = vld [vmem:[%s3805_s1 + $0x4c4] ss:$16 sps:$4 sm:$0xff]   ;;  %v2625_v30 = vld [vmem:[%s3805_s1 + $0x4c0] ss:$16 sps:$4 sm:$0xff]  }
  0x2a   :  { %v2633_v32 = vld [vmem:[%s3805_s1 + $0x4e4] ss:$16 sps:$4 sm:$0xff]   ;;  %v2631_v35 = vld [vmem:[%s3805_s1 + $0x4e0] ss:$16 sps:$4 sm:$0xff]  }
  0x2b   :  { %1295 = vmatpush1.bf16.msra.mxu1 %v2551_v42  ;;  %v3242_v34 = vld [vmem:[%s3806_s0 + $0x14] ss:$28 sps:$4 sm:$0xff]   ;;  %v2648_v42 = vld [vmem:[%s3805_s1 + $0x12c] ss:$16 sps:$4 sm:$0xff]  }
  0x2c   :  { %1338 = vmatpush1.bf16.msra.mxu0 %v2552_v43  ;;  %1296 = vmatprep.subr.bf16.mxu1 %v2553_v44  ;;  %v2639_v37 = vld [vmem:[%s3805_s1 + $0x504] ss:$16 sps:$4 sm:$0xff]   ;;  %v2637_v39 = vld [vmem:[%s3805_s1 + $0x500] ss:$16 sps:$4 sm:$0xff]   ;;  %v2646_v44 = vld [vmem:[%s3805_s1 + $0x128] ss:$16 sps:$4 sm:$0xff]  }
  0x2d   :  { %1339 = vmatprep.subr.bf16.mxu0 %v2555_v45  ;;  %v2645_v41 = vld [vmem:[%s3805_s1 + $0x524] ss:$16 sps:$4 sm:$0xff]   ;;  %v2643_v43 = vld [vmem:[%s3805_s1 + $0x520] ss:$16 sps:$4 sm:$0xff]  }
  0x2e   :  { %v2651_v45 = vld [vmem:[%s3805_s1 + $0x544] ss:$16 sps:$4 sm:$0xff]  }
  0x2f   :  { %1297 = vmatpush1.bf16.msra.mxu1 %v2557_v46  ;;  %v2654_v46 = vld [vmem:[%s3805_s1 + $0x14c] ss:$16 sps:$4 sm:$0xff]  }
  0x30   :  { %1340 = vmatpush1.bf16.msra.mxu0 %v2558_v47  ;;  %1298 = vmatprep.subr.bf16.mxu1 %v2559_v48  ;;  %v2649_v47 = vld [vmem:[%s3805_s1 + $0x540] ss:$16 sps:$4 sm:$0xff]   ;;  %v2652_v48 = vld [vmem:[%s3805_s1 + $0x148] ss:$16 sps:$4 sm:$0xff]  }
  0x31   :  { %1341 = vmatprep.subr.bf16.mxu0 %v2561_v50  ;;  %v2660_v50 = vld [vmem:[%s3805_s1 + $0x16c] ss:$16 sps:$4 sm:$0xff]  }
  0x33   :  { %1299 = vmatpush1.bf16.msra.mxu1 %v2563_v52  ;;  %v2655_v52 = vld [vmem:[%s3805_s1 + $0x560] ss:$16 sps:$4 sm:$0xff]  }
  0x34   :  { %1342 = vmatpush1.bf16.msra.mxu0 %v2564_v53  ;;  %1300 = vmatprep.subr.bf16.mxu1 %v2565_v54  ;;  %v2658_v53 = vld [vmem:[%s3805_s1 + $0x168] ss:$16 sps:$4 sm:$0xff]   ;;  %v2663_v54 = vld [vmem:[%s3805_s1 + $0x584] ss:$16 sps:$4 sm:$0xff]  }
  0x35   :  { %1343 = vmatprep.subr.bf16.mxu0 %v2567_v55  ;;  %v2666_v55 = vld [vmem:[%s3805_s1 + $0x18c] ss:$16 sps:$4 sm:$0xff]  }
  0x37   :  { %1301 = vmatpush1.bf16.msra.mxu1 %v2569_v56  ;;  %v2661_v56 = vld [vmem:[%s3805_s1 + $0x580] ss:$16 sps:$4 sm:$0xff]  }
  0x38   :  { %1344 = vmatpush1.bf16.msra.mxu0 %v2570_v57  ;;  %1302 = vmatprep.subr.bf16.mxu1 %v2571_v58  ;;  %v2664_v57 = vld [vmem:[%s3805_s1 + $0x188] ss:$16 sps:$4 sm:$0xff]   ;;  %v2669_v58 = vld [vmem:[%s3805_s1 + $0x5a4] ss:$16 sps:$4 sm:$0xff]  }
  0x39   :  { %1345 = vmatprep.subr.bf16.mxu0 %v2573_v59  ;;  %v2672_v59 = vld [vmem:[%s3805_s1 + $0x1ac] ss:$16 sps:$4 sm:$0xff]  }
  0x3b   :  { %1303 = vmatpush1.bf16.msra.mxu1 %v2575_v60  ;;  %v2667_v60 = vld [vmem:[%s3805_s1 + $0x5a0] ss:$16 sps:$4 sm:$0xff]  }
  0x3c   :  { %1346 = vmatpush1.bf16.msra.mxu0 %v2576_v61  ;;  %1304 = vmatprep.subr.bf16.mxu1 %v2577_v62  ;;  %v2670_v61 = vld [vmem:[%s3805_s1 + $0x1a8] ss:$16 sps:$4 sm:$0xff]   ;;  %v2675_v62 = vld [vmem:[%s3805_s1 + $0x5c4] ss:$16 sps:$4 sm:$0xff]  }
  0x3d   :  { %1347 = vmatprep.subr.bf16.mxu0 %v2579_v63  ;;  %v2678_v63 = vld [vmem:[%s3805_s1 + $0x1cc] ss:$16 sps:$4 sm:$0xff]  }
  0x3f   :  { %1305 = vmatpush1.bf16.msra.mxu1 %v2581_v0  ;;  %v2673_v0 = vld [vmem:[%s3805_s1 + $0x5c0] ss:$16 sps:$4 sm:$0xff]  }
  0x40   :  { %1348 = vmatpush1.bf16.msra.mxu0 %v2582_v1  ;;  %1446 = vmatprep.subr.bf16.mxu1 %v2594_v3  ;;  %v2676_v1 = vld [vmem:[%s3805_s1 + $0x1c8] ss:$16 sps:$4 sm:$0xff]   ;;  %v2684_v3 = vld [vmem:[%s3805_s1 + $0x1ec] ss:$16 sps:$4 sm:$0xff]  }
  0x41   :  { %1360 = vmatprep.subr.bf16.mxu0 %v2591_v2  ;;  %v2681_v2 = vld [vmem:[%s3805_s1 + $0x5e4] ss:$16 sps:$4 sm:$0xff]  }
  0x42   :  { %1307 = vmatmul.mubr.bf16.vlgmr.msra.gmra.mrb[0].mxu1 %v3146_v4 }
  0x43   :  { %1350 = vmatmul.mubr.bf16.vlgmr.msra.gmra.mrb[0].mxu0 %v3151_v5  ;;  %1447 = vmatpush1.bf16.msra.mxu1 %v2592_v7  ;;  %v2682_v7 = vld [vmem:[%s3805_s1 + $0x1e8] ss:$16 sps:$4 sm:$0xff]  }
  0x44   :  { %1361 = vmatpush1.bf16.msra.mxu0 %v2589_v6  ;;  %1448 = vmatprep.subr.bf16.mxu1 %v2600_v9  ;;  %v2679_v6 = vld [vmem:[%s3805_s1 + $0x5e0] ss:$16 sps:$4 sm:$0xff]   ;;  %v2696_v9 = vld [vmem:[%s3805_s1 + $0x604] ss:$16 sps:$4 sm:$0xff]  }
  0x45   :  { %1362 = vmatprep.subr.bf16.mxu0 %v2597_v8  ;;  %1478 = vmatprep.mubr.bf16.mxu1 %v2585_v49  ;;  %v2657_v49 = vld [vmem:[%s3805_s1 + $0x564] ss:$16 sps:$4 sm:$0xff]   ;;  %v2690_v8 = vld [vmem:[%s3805_s1 + $0x20c] ss:$16 sps:$4 sm:$0xff]  }
  0x46   :  { %1392 = vmatprep.mubr.bf16.mxu0 %v3242_v34 }
  0x47   :  { %1449 = vmatpush1.bf16.msra.mxu1 %v2598_v11  ;;  %v2688_v11 = vld [vmem:[%s3805_s1 + $0x208] ss:$16 sps:$4 sm:$0xff]  }
  0x48   :  { %1363 = vmatpush1.bf16.msra.mxu0 %v2595_v10  ;;  %1450 = vmatprep.subr.bf16.mxu1 %v2606_v13  ;;  %v3356_v10 = vld [vmem:[%s3806_s0 + $0x10] ss:$28 sps:$4 sm:$0xff]  }
  0x49   :  { %1364 = vmatprep.subr.bf16.mxu0 %v2603_v12  ;;  %v2694_v12 = vld [vmem:[%s3805_s1 + $0x600] ss:$16 sps:$4 sm:$0xff]   ;;  %v2693_v13 = vld [vmem:[%s3805_s1 + $0x22c] ss:$16 sps:$4 sm:$0xff]  }
  0x4b   :  { %1451 = vmatpush1.bf16.msra.mxu1 %v2604_v15  ;;  %v2699_v15 = vld [vmem:[%s3805_s1 + $0x24c] ss:$16 sps:$4 sm:$0xff]  }
  0x4c   :  { %1365 = vmatpush1.bf16.msra.mxu0 %v2601_v14  ;;  %1452 = vmatprep.subr.bf16.mxu1 %v2612_v17  ;;  %v2691_v14 = vld [vmem:[%s3805_s1 + $0x228] ss:$16 sps:$4 sm:$0xff]   ;;  %v2703_v17 = vld [vmem:[%s3805_s1 + $0x26c] ss:$16 sps:$4 sm:$0xff]  }
  0x4d   :  { %1366 = vmatprep.subr.bf16.mxu0 %v2609_v16  ;;  %v2895_v16 = vmov 0  }
  0x4f   :  { %1453 = vmatpush1.bf16.msra.mxu1 %v2610_v19  ;;  %v2706_v19 = vld [vmem:[%s3805_s1 + $0x28c] ss:$16 sps:$4 sm:$0xff]  }
  0x50   :  { %1367 = vmatpush1.bf16.msra.mxu0 %v2607_v18  ;;  %1454 = vmatprep.subr.bf16.mxu1 %v2618_v21  ;;  %v3386_v18 = vld [vmem:[%s3806_s0 + $0x18] ss:$28 sps:$4 sm:$0xff]   ;;  %v2709_v21 = vld [vmem:[%s3805_s1 + $0x2ac] ss:$16 sps:$4 sm:$0xff]  }
  0x51   :  { %1368 = vmatprep.subr.bf16.mxu0 %v2615_v20  ;;  %v2704_v20 = vld [vmem:[%s3805_s1 + $0x288] ss:$16 sps:$4 sm:$0xff]  }
  0x53   :  { %1455 = vmatpush1.bf16.msra.mxu1 %v2616_v23  ;;  %v2712_v23 = vld [vmem:[%s3805_s1 + $0x2cc] ss:$16 sps:$4 sm:$0xff]  }
  0x54   :  { %1369 = vmatpush1.bf16.msra.mxu0 %v2613_v22  ;;  %1456 = vmatprep.subr.bf16.mxu1 %v2624_v25  ;;  %v2707_v22 = vld [vmem:[%s3805_s1 + $0x2a8] ss:$16 sps:$4 sm:$0xff]   ;;  %v2715_v25 = vld [vmem:[%s3805_s1 + $0x2ec] ss:$16 sps:$4 sm:$0xff]  }
  0x55   :  { %1370 = vmatprep.subr.bf16.mxu0 %v2621_v24  ;;  %v2710_v24 = vld [vmem:[%s3805_s1 + $0x2c8] ss:$16 sps:$4 sm:$0xff]  }
  0x57   :  { %1457 = vmatpush1.bf16.msra.mxu1 %v2622_v27  ;;  %v2791_v27 = vld [vmem:[%s3807_s3] ss:$8 sps:$4 sm:$0xff]  }
  0x58   :  { %1371 = vmatpush1.bf16.msra.mxu0 %v2619_v26  ;;  %1458 = vmatprep.subr.bf16.mxu1 %v2630_v29  ;;  %v2713_v26 = vld [vmem:[%s3805_s1 + $0x2e8] ss:$16 sps:$4 sm:$0xff]   ;;  %v2718_v29 = vld [vmem:[%s3805_s1 + $0x30c] ss:$16 sps:$4 sm:$0xff]  }
  0x59   :  { %1372 = vmatprep.subr.bf16.mxu0 %v2627_v28  ;;  %v2793_v28 = vld [vmem:[%s3807_s3 + $0x4] ss:$8 sps:$4 sm:$0xff]  }
  0x5b   :  { %1459 = vmatpush1.bf16.msra.mxu1 %v2628_v31  ;;  %v2716_v31 = vld [vmem:[%s3805_s1 + $0x308] ss:$16 sps:$4 sm:$0xff]  }
  0x5c   :  { %1373 = vmatpush1.bf16.msra.mxu0 %v2625_v30  ;;  %1460 = vmatprep.subr.bf16.mxu1 %v2636_v33  ;;  %v2796_v30 = vld [vmem:[%s3807_s3 + $0x14] ss:$8 sps:$4 sm:$0xff]   ;;  %v2799_v33 = vld [vmem:[%s3807_s3 + $0x24] ss:$8 sps:$4 sm:$0xff]  }
  0x5d   :  { %1374 = vmatprep.subr.bf16.mxu0 %v2633_v32  ;;  %v2794_v32 = vld [vmem:[%s3807_s3 + $0x10] ss:$8 sps:$4 sm:$0xff]  }
  0x5f   :  { %1461 = vmatpush1.bf16.msra.mxu1 %v2634_v36  ;;  %v2719_v36 = vld [vmem:[%s3805_s1 + $0x328] ss:$16 sps:$4 sm:$0xff]  }
  0x60   :  { %1375 = vmatpush1.bf16.msra.mxu0 %v2631_v35  ;;  %1462 = vmatprep.subr.bf16.mxu1 %v2642_v38  ;;  %v2721_v35 = vld [vmem:[%s3805_s1 + $0x32c] ss:$16 sps:$4 sm:$0xff]  }
  0x61   :  { %1376 = vmatprep.subr.bf16.mxu0 %v2639_v37  ;;  %v2797_v37 = vld [vmem:[%s3807_s3 + $0x20] ss:$8 sps:$4 sm:$0xff]   ;;  %v2802_v38 = vld [vmem:[%s3807_s3 + $0x34] ss:$8 sps:$4 sm:$0xff]  }
  0x63   :  { %1463 = vmatpush1.bf16.msra.mxu1 %v2640_v40  ;;  %v2722_v40 = vld [vmem:[%s3805_s1 + $0x348] ss:$16 sps:$4 sm:$0xff]  }
  0x64   :  { %1377 = vmatpush1.bf16.msra.mxu0 %v2637_v39  ;;  %1464 = vmatprep.subr.bf16.mxu1 %v2648_v42  ;;  %v2724_v39 = vld [vmem:[%s3805_s1 + $0x34c] ss:$16 sps:$4 sm:$0xff]  }
  0x65   :  { %1378 = vmatprep.subr.bf16.mxu0 %v2645_v41  ;;  %v2800_v41 = vld [vmem:[%s3807_s3 + $0x30] ss:$8 sps:$4 sm:$0xff]   ;;  %v2805_v42 = vld [vmem:[%s3807_s3 + $0x44] ss:$8 sps:$4 sm:$0xff]  }
  0x67   :  { %1465 = vmatpush1.bf16.msra.mxu1 %v2646_v44  ;;  %v2725_v44 = vld [vmem:[%s3805_s1 + $0x368] ss:$16 sps:$4 sm:$0xff]  }
  0x68   :  { %1379 = vmatpush1.bf16.msra.mxu0 %v2643_v43  ;;  %1466 = vmatprep.subr.bf16.mxu1 %v2654_v46  ;;  %v2727_v43 = vld [vmem:[%s3805_s1 + $0x36c] ss:$16 sps:$4 sm:$0xff]   ;;  %v2803_v46 = vld [vmem:[%s3807_s3 + $0x40] ss:$8 sps:$4 sm:$0xff]  }
  0x69   :  { %1380 = vmatprep.subr.bf16.mxu0 %v2651_v45  ;;  %v2730_v45 = vld [vmem:[%s3805_s1 + $0x38c] ss:$16 sps:$4 sm:$0xff]  }
  0x6b   :  { %1467 = vmatpush1.bf16.msra.mxu1 %v2652_v48  ;;  %v2806_v48 = vld [vmem:[%s3807_s3 + $0x50] ss:$8 sps:$4 sm:$0xff]  }
  0x6c   :  { %1381 = vmatpush1.bf16.msra.mxu0 %v2649_v47  ;;  %1468 = vmatprep.subr.bf16.mxu1 %v2660_v50  ;;  %v2808_v47 = vld [vmem:[%s3807_s3 + $0x54] ss:$8 sps:$4 sm:$0xff]   ;;  %v2811_v50 = vld [vmem:[%s3807_s3 + $0x64] ss:$8 sps:$4 sm:$0xff]  }
  0x6d   :  { %1382 = vmatprep.subr.bf16.mxu0 %v2657_v49  ;;  %v2728_v49 = vld [vmem:[%s3805_s1 + $0x388] ss:$16 sps:$4 sm:$0xff]  }
  0x6f   :  { %1469 = vmatpush1.bf16.msra.mxu1 %v2658_v53  ;;  %v2809_v53 = vld [vmem:[%s3807_s3 + $0x60] ss:$8 sps:$4 sm:$0xff]  }
  0x70   :  { %1383 = vmatpush1.bf16.msra.mxu0 %v2655_v52  ;;  %1470 = vmatprep.subr.bf16.mxu1 %v2666_v55  ;;  %v2733_v52 = vld [vmem:[%s3805_s1 + $0x3ac] ss:$16 sps:$4 sm:$0xff]  }
  0x71   :  { %1384 = vmatprep.subr.bf16.mxu0 %v2663_v54  ;;  %v2731_v54 = vld [vmem:[%s3805_s1 + $0x3a8] ss:$16 sps:$4 sm:$0xff]   ;;  %v2814_v55 = vld [vmem:[%s3807_s3 + $0x74] ss:$8 sps:$4 sm:$0xff]  }
  0x73   :  { %1471 = vmatpush1.bf16.msra.mxu1 %v2664_v57  ;;  %v2812_v57 = vld [vmem:[%s3807_s3 + $0x70] ss:$8 sps:$4 sm:$0xff]  }
  0x74   :  { %1385 = vmatpush1.bf16.msra.mxu0 %v2661_v56  ;;  %1472 = vmatprep.subr.bf16.mxu1 %v2672_v59  ;;  %v2736_v56 = vld [vmem:[%s3805_s1 + $0x3cc] ss:$16 sps:$4 sm:$0xff]  }
  0x75   :  { %1386 = vmatprep.subr.bf16.mxu0 %v2669_v58  ;;  %v2734_v58 = vld [vmem:[%s3805_s1 + $0x3c8] ss:$16 sps:$4 sm:$0xff]   ;;  %v2817_v59 = vld [vmem:[%s3807_s3 + $0x84] ss:$8 sps:$4 sm:$0xff]  }
  0x77   :  { %1473 = vmatpush1.bf16.msra.mxu1 %v2670_v61  ;;  %v2815_v61 = vld [vmem:[%s3807_s3 + $0x80] ss:$8 sps:$4 sm:$0xff]  }
  0x78   :  { %1387 = vmatpush1.bf16.msra.mxu0 %v2667_v60  ;;  %1474 = vmatprep.subr.bf16.mxu1 %v2678_v63  ;;  %v2739_v60 = vld [vmem:[%s3805_s1 + $0x3ec] ss:$16 sps:$4 sm:$0xff]  }
  0x79   :  { %1388 = vmatprep.subr.bf16.mxu0 %v2675_v62  ;;  %v2737_v62 = vld [vmem:[%s3805_s1 + $0x3e8] ss:$16 sps:$4 sm:$0xff]   ;;  %v2820_v63 = vld [vmem:[%s3807_s3 + $0x94] ss:$8 sps:$4 sm:$0xff]  }
  0x7b   :  { %1475 = vmatpush1.bf16.msra.mxu1 %v2676_v1  ;;  %v2818_v1 = vld [vmem:[%s3807_s3 + $0x90] ss:$8 sps:$4 sm:$0xff]  }
  0x7c   :  { %1389 = vmatpush1.bf16.msra.mxu0 %v2673_v0  ;;  %1476 = vmatprep.subr.bf16.mxu1 %v2684_v3  ;;  %v2742_v0 = vld [vmem:[%s3805_s1 + $0x40c] ss:$16 sps:$4 sm:$0xff]  }
  0x7d   :  { %1390 = vmatprep.subr.bf16.mxu0 %v2681_v2  ;;  %v2740_v2 = vld [vmem:[%s3805_s1 + $0x408] ss:$16 sps:$4 sm:$0xff]   ;;  %v2745_v3 = vld [vmem:[%s3805_s1 + $0x42c] ss:$16 sps:$4 sm:$0xff]  }
  0x7f   :  { %1477 = vmatpush1.bf16.msra.mxu1 %v2682_v7  ;;  %v2821_v7 = vld [vmem:[%s3807_s3 + $0xa0] ss:$8 sps:$4 sm:$0xff]  }
  0x80   :  { %1391 = vmatpush1.bf16.msra.mxu0 %v2679_v6  ;;  %1489 = vmatprep.subr.bf16.mxu1 %v2690_v8  ;;  %v2823_v6 = vld [vmem:[%s3807_s3 + $0xa4] ss:$8 sps:$4 sm:$0xff]   ;;  %v2743_v8 = vld [vmem:[%s3805_s1 + $0x428] ss:$16 sps:$4 sm:$0xff]  }
  0x81   :  { %1403 = vmatprep.subr.bf16.mxu0 %v2696_v9  ;;  %v2826_v9 = vld [vmem:[%s3807_s3 + $0xb4] ss:$8 sps:$4 sm:$0xff]  }
  0x82   :  { %1479 = vmatmul.mubr.bf16.vlgmr.msra.gmra.mrb[4].mxu1 %v3146_v4  ;;  %v2697_v4 = vld [vmem:[%s3805_s1 + $0x248] ss:$16 sps:$4 sm:$0xff]  }
  0x83   :  { %1393 = vmatmul.mubr.bf16.vlgmr.msra.gmra.mrb[0].mxu0 %v3356_v10  ;;  %1490 = vmatpush1.bf16.msra.mxu1 %v2688_v11  ;;  %v2824_v11 = vld [vmem:[%s3807_s3 + $0xb0] ss:$8 sps:$4 sm:$0xff]  }
  0x84   :  { %1404 = vmatpush1.bf16.msra.mxu0 %v2694_v12  ;;  %1491 = vmatprep.subr.bf16.mxu1 %v2693_v13  ;;  %v2829_v12 = vld [vmem:[%s3807_s3 + $0xc4] ss:$8 sps:$4 sm:$0xff]  }
  0x85   :  { %1435 = vmatprep.mubr.bf16.mxu0 %v2895_v16  ;;  %1521 = vmatprep.mubr.bf16.mxu1 %v3092_v51  ;;  %v2701_v51 = vld [vmem:[%s3805_s1 + $0x268] ss:$16 sps:$4 sm:$0xff]   ;;  %v2751_v13 = vld [vmem:[%s3805_s1 + $0x46c] ss:$16 sps:$4 sm:$0xff]  }
  0x86   :  { %2034 = vmatprep.subr.bf16.mxu0 %v2793_v28  ;;  %v2830_v28 = vld [vmem:[%s3807_s3 + $0xd0] ss:$8 sps:$4 sm:$0xff]  }
  0x87   :  { %1492 = vmatpush1.bf16.msra.mxu1 %v2691_v14  ;;  %v2827_v14 = vld [vmem:[%s3807_s3 + $0xc0] ss:$8 sps:$4 sm:$0xff]  }
  0x88   :  { %1493 = vmatprep.subr.bf16.mxu1 %v2699_v15  ;;  %v2749_v15 = vld [vmem:[%s3805_s1 + $0x468] ss:$16 sps:$4 sm:$0xff]  }
  0x8b   :  { %1494 = vmatpush1.bf16.msra.mxu1 %v2697_v4  ;;  %v2754_v4 = vld [vmem:[%s3805_s1 + $0x48c] ss:$16 sps:$4 sm:$0xff]  }
  0x8c   :  { %1495 = vmatprep.subr.bf16.mxu1 %v2703_v17  ;;  %v2752_v17 = vld [vmem:[%s3805_s1 + $0x488] ss:$16 sps:$4 sm:$0xff]  }
  0x8f   :  { %2379 = vmatmul.mubr.msk.bf16.vlgmr.msra.gmra.mrb[0].mxu0 %vm1270_vm0, %v3386_v18  ;;  %1496 = vmatpush1.bf16.msra.mxu1 %v2701_v51  ;;  %v2757_v51 = vld [vmem:[%s3805_s1 + $0x4ac] ss:$16 sps:$4 sm:$0xff]  }
  0x90   :  { %1497 = vmatprep.subr.bf16.mxu1 %v2706_v19  ;;  %2035 = vmatpush1.bf16.msra.mxu0 %v2791_v27  ;;  %v2755_v19 = vld [vmem:[%s3805_s1 + $0x4a8] ss:$16 sps:$4 sm:$0xff]   ;;  %v2832_v27 = vld [vmem:[%s3807_s3 + $0xd4] ss:$8 sps:$4 sm:$0xff]  }
  0x91   :  { %2036 = vmatprep.subr.bf16.mxu0 %v2796_v30  ;;  %v2772_v30 = vld [vmem:[%s3805_s1 + $0x54c] ss:$16 sps:$4 sm:$0xff]  }
  0x93   :  { %1498 = vmatpush1.bf16.msra.mxu1 %v2704_v20  ;;  %v2760_v20 = vld [vmem:[%s3805_s1 + $0x4cc] ss:$16 sps:$4 sm:$0xff]  }
  0x94   :  { %1499 = vmatprep.subr.bf16.mxu1 %v2709_v21  ;;  %2037 = vmatpush1.bf16.msra.mxu0 %v2794_v32  ;;  %v2758_v21 = vld [vmem:[%s3805_s1 + $0x4c8] ss:$16 sps:$4 sm:$0xff]  }
  0x95   :  { %2038 = vmatprep.subr.bf16.mxu0 %v2799_v33  ;;  %v2833_v32 = vld [vmem:[%s3807_s3 + $0xe0] ss:$8 sps:$4 sm:$0xff]  }
  0x96   :  { %v2770_v33 = vld [vmem:[%s3805_s1 + $0x548] ss:$16 sps:$4 sm:$0xff]  }
  0x97   :  { %1500 = vmatpush1.bf16.msra.mxu1 %v2707_v22  ;;  %v2763_v22 = vld [vmem:[%s3805_s1 + $0x4ec] ss:$16 sps:$4 sm:$0xff]  }
  0x98   :  { %1501 = vmatprep.subr.bf16.mxu1 %v2712_v23  ;;  %2039 = vmatpush1.bf16.msra.mxu0 %v2797_v37  ;;  %v2761_v23 = vld [vmem:[%s3805_s1 + $0x4e8] ss:$16 sps:$4 sm:$0xff]  }
  0x99   :  { %2040 = vmatprep.subr.bf16.mxu0 %v2802_v38  ;;  %v2836_v37 = vld [vmem:[%s3807_s3 + $0xf0] ss:$8 sps:$4 sm:$0xff]  }
  0x9a   :  { %v2773_v38 = vld [vmem:[%s3805_s1 + $0x568] ss:$16 sps:$4 sm:$0xff]  }
  0x9b   :  { %1502 = vmatpush1.bf16.msra.mxu1 %v2710_v24  ;;  %v2766_v24 = vld [vmem:[%s3805_s1 + $0x50c] ss:$16 sps:$4 sm:$0xff]  }
  0x9c   :  { %1503 = vmatprep.subr.bf16.mxu1 %v2715_v25  ;;  %2041 = vmatpush1.bf16.msra.mxu0 %v2800_v41  ;;  %v2764_v25 = vld [vmem:[%s3805_s1 + $0x508] ss:$16 sps:$4 sm:$0xff]  }
  0x9d   :  { %2042 = vmatprep.subr.bf16.mxu0 %v2805_v42  ;;  %v2776_v41 = vld [vmem:[%s3805_s1 + $0x588] ss:$16 sps:$4 sm:$0xff]   ;;  %v2781_v42 = vld [vmem:[%s3805_s1 + $0x5ac] ss:$16 sps:$4 sm:$0xff]  }
  0x9f   :  { %1504 = vmatpush1.bf16.msra.mxu1 %v2713_v26  ;;  %v2769_v26 = vld [vmem:[%s3805_s1 + $0x52c] ss:$16 sps:$4 sm:$0xff]  }
  0xa0   :  { %1505 = vmatprep.subr.bf16.mxu1 %v2718_v29  ;;  %2043 = vmatpush1.bf16.msra.mxu0 %v2803_v46  ;;  %v2767_v29 = vld [vmem:[%s3805_s1 + $0x528] ss:$16 sps:$4 sm:$0xff]   ;;  %v2787_v46 = vld [vmem:[%s3805_s1 + $0x5ec] ss:$16 sps:$4 sm:$0xff]  }
  0xa1   :  { %2044 = vmatprep.subr.bf16.mxu0 %v2808_v47  ;;  %v2785_v47 = vld [vmem:[%s3805_s1 + $0x5e8] ss:$16 sps:$4 sm:$0xff]  }
  0xa3   :  { %1506 = vmatpush1.bf16.msra.mxu1 %v2716_v31  ;;  %v2835_v31 = vld [vmem:[%s3807_s3 + $0xe4] ss:$8 sps:$4 sm:$0xff]  }
  0xa4   :  { %1507 = vmatprep.subr.bf16.mxu1 %v2721_v35  ;;  %2045 = vmatpush1.bf16.msra.mxu0 %v2806_v48  ;;  %v2775_v35 = vld [vmem:[%s3805_s1 + $0x56c] ss:$16 sps:$4 sm:$0xff]  }
  0xa5   :  { %2046 = vmatprep.subr.bf16.mxu0 %v2811_v50  ;;  %v2790_v48 = vld [vmem:[%s3805_s1 + $0x60c] ss:$16 sps:$4 sm:$0xff]  }
  0xa7   :  { %1508 = vmatpush1.bf16.msra.mxu1 %v2719_v36  ;;  %v2838_v36 = vld [vmem:[%s3807_s3 + $0xf4] ss:$8 sps:$4 sm:$0xff]  }
  0xa8   :  { %1509 = vmatprep.subr.bf16.mxu1 %v2724_v39  ;;  %2047 = vmatpush1.bf16.msra.mxu0 %v2809_v53  ;;  %v2778_v39 = vld [vmem:[%s3805_s1 + $0x58c] ss:$16 sps:$4 sm:$0xff]  }
  0xa9   :  { %2048 = vmatprep.subr.bf16.mxu0 %v2814_v55  ;;  %v235_v55 = vlaneseq }
  0xab   :  { %1510 = vmatpush1.bf16.msra.mxu1 %v2722_v40  ;;  %v2841_v40 = vld [vmem:[%s3807_s3 + $0x104] ss:$8 sps:$4 sm:$0xff]  }
  0xac   :  { %1511 = vmatprep.subr.bf16.mxu1 %v2727_v43  ;;  %2049 = vmatpush1.bf16.msra.mxu0 %v2812_v57  ;;  %v2779_v43 = vld [vmem:[%s3805_s1 + $0x5a8] ss:$16 sps:$4 sm:$0xff]  }
  0xad   :  { %2050 = vmatprep.subr.bf16.mxu0 %v2817_v59 }
  0xaf   :  { %1512 = vmatpush1.bf16.msra.mxu1 %v2725_v44  ;;  %v2784_v44 = vld [vmem:[%s3805_s1 + $0x5cc] ss:$16 sps:$4 sm:$0xff]  }
  0xb0   :  { %1513 = vmatprep.subr.bf16.mxu1 %v2730_v45  ;;  %2051 = vmatpush1.bf16.msra.mxu0 %v2815_v61  ;;  %v2782_v45 = vld [vmem:[%s3805_s1 + $0x5c8] ss:$16 sps:$4 sm:$0xff]  }
  0xb1   :  { %2052 = vmatprep.subr.bf16.mxu0 %v2820_v63 }
  0xb3   :  { %1514 = vmatpush1.bf16.msra.mxu1 %v2728_v49  ;;  %v2788_v49 = vld [vmem:[%s3805_s1 + $0x608] ss:$16 sps:$4 sm:$0xff]  }
  0xb4   :  { %1515 = vmatprep.subr.bf16.mxu1 %v2733_v52  ;;  %2053 = vmatpush1.bf16.msra.mxu0 %v2818_v1 }
  0xb5   :  { %2054 = vmatprep.subr.bf16.mxu0 %v2823_v6 }
  0xb7   :  { %1516 = vmatpush1.bf16.msra.mxu1 %v2731_v54 }
  0xb8   :  { %1517 = vmatprep.subr.bf16.mxu1 %v2736_v56  ;;  %2055 = vmatpush1.bf16.msra.mxu0 %v2821_v7  ;;  %v3672_v56 = vshrl.u32 %v235_v55, 7 }
  0xb9   :  { %2056 = vmatprep.subr.bf16.mxu0 %v2826_v9 }
  0xba   :  { %v3675_v57 = vsub.s32 0, %v3672_v56 }
  0xbb   :  { %1518 = vmatpush1.bf16.msra.mxu1 %v2734_v58 }
  0xbc   :  { %1519 = vmatprep.subr.bf16.mxu1 %v2739_v60  ;;  %2057 = vmatpush1.bf16.msra.mxu0 %v2824_v11 }
  0xbd   :  { %2058 = vmatprep.subr.bf16.mxu0 %v2829_v12 }
  0xbf   :  { %1520 = vmatpush1.bf16.msra.mxu1 %v2737_v62 }
  0xc0   :  { %1532 = vmatprep.subr.bf16.mxu1 %v2742_v0  ;;  %2059 = vmatpush1.bf16.msra.mxu0 %v2827_v14 }
  0xc1   :  { %2060 = vmatprep.subr.bf16.mxu0 %v2832_v27  ;;  %v2856_v27 = vld [vmem:[%s3807_s3 + $0x154] ss:$8 sps:$4 sm:$0xff]  }
  0xc2   :  { %1522 = vmatmul.mubr.bf16.vlgmr.msra.gmra.mrb[4].mxu1 %v3151_v5  ;;  %v2748_v5 = vld [vmem:[%s3805_s1 + $0x44c] ss:$16 sps:$4 sm:$0xff]  }
  0xc3   :  { %1533 = vmatpush1.bf16.msra.mxu1 %v2740_v2  ;;  %1564 = vmatprep.mubr.bf16.mxu1 %v3242_v34  ;;  %v2746_v34 = vld [vmem:[%s3805_s1 + $0x448] ss:$16 sps:$4 sm:$0xff]  }
  0xc4   :  { %1534 = vmatprep.subr.bf16.mxu1 %v2745_v3  ;;  %2061 = vmatpush1.bf16.msra.mxu0 %v2830_v28  ;;  %v2854_v28 = vld [vmem:[%s3807_s3 + $0x150] ss:$8 sps:$4 sm:$0xff]  }
  0xc5   :  { %2062 = vmatprep.subr.bf16.mxu0 %v2835_v31  ;;  %v2862_v31 = vld [vmem:[%s3807_s3 + $0x174] ss:$8 sps:$4 sm:$0xff]  }
  0xc7   :  { %1535 = vmatpush1.bf16.msra.mxu1 %v2743_v8 }
  0xc8   :  { %1536 = vmatprep.subr.bf16.mxu1 %v2748_v5  ;;  %2063 = vmatpush1.bf16.msra.mxu0 %v2833_v32  ;;  %v2860_v32 = vld [vmem:[%s3807_s3 + $0x170] ss:$8 sps:$4 sm:$0xff]  }
  0xc9   :  { %2064 = vmatprep.subr.bf16.mxu0 %v2838_v36  ;;  %v2868_v36 = vld [vmem:[%s3807_s3 + $0x194] ss:$8 sps:$4 sm:$0xff]  }
  0xcb   :  { %1537 = vmatpush1.bf16.msra.mxu1 %v2746_v34 }
  0xcc   :  { %1538 = vmatprep.subr.bf16.mxu1 %v2751_v13  ;;  %2065 = vmatpush1.bf16.msra.mxu0 %v2836_v37  ;;  %v2866_v37 = vld [vmem:[%s3807_s3 + $0x190] ss:$8 sps:$4 sm:$0xff]  }
  0xcd   :  { %2077 = vmatprep.subr.bf16.mxu0 %v2841_v40  ;;  %v2874_v40 = vld [vmem:[%s3807_s3 + $0x1b4] ss:$8 sps:$4 sm:$0xff]  }
  0xcf   :  { %1539 = vmatpush1.bf16.msra.mxu1 %v2749_v15 }
  0xd0   :  { %1540 = vmatprep.subr.bf16.mxu1 %v2754_v4 }
  0xd3   :  { %1541 = vmatpush1.bf16.msra.mxu1 %v2752_v17 }
  0xd4   :  { %1542 = vmatprep.subr.bf16.mxu1 %v2757_v51  ;;  %v2839_v51 = vld [vmem:[%s3807_s3 + $0x100] ss:$8 sps:$4 sm:$0xff]  }
  0xd7   :  { %1543 = vmatpush1.bf16.msra.mxu1 %v2755_v19  ;;  %v2844_v19 = vld [vmem:[%s3807_s3 + $0x114] ss:$8 sps:$4 sm:$0xff]  }
  0xd8   :  { %1544 = vmatprep.subr.bf16.mxu1 %v2760_v20  ;;  %v2842_v20 = vld [vmem:[%s3807_s3 + $0x110] ss:$8 sps:$4 sm:$0xff]  }
  0xdb   :  { %1545 = vmatpush1.bf16.msra.mxu1 %v2758_v21  ;;  %v2847_v21 = vld [vmem:[%s3807_s3 + $0x124] ss:$8 sps:$4 sm:$0xff]  }
  0xdc   :  { %1546 = vmatprep.subr.bf16.mxu1 %v2763_v22  ;;  %v2845_v22 = vld [vmem:[%s3807_s3 + $0x120] ss:$8 sps:$4 sm:$0xff]  }
  0xdf   :  { %1547 = vmatpush1.bf16.msra.mxu1 %v2761_v23  ;;  %v2850_v23 = vld [vmem:[%s3807_s3 + $0x134] ss:$8 sps:$4 sm:$0xff]  }
  0xe0   :  { %1548 = vmatprep.subr.bf16.mxu1 %v2766_v24  ;;  %v2848_v24 = vld [vmem:[%s3807_s3 + $0x130] ss:$8 sps:$4 sm:$0xff]  }
  0xe3   :  { %1549 = vmatpush1.bf16.msra.mxu1 %v2764_v25  ;;  %v2853_v25 = vld [vmem:[%s3807_s3 + $0x144] ss:$8 sps:$4 sm:$0xff]  }
  0xe4   :  { %1550 = vmatprep.subr.bf16.mxu1 %v2769_v26  ;;  %v2851_v26 = vld [vmem:[%s3807_s3 + $0x140] ss:$8 sps:$4 sm:$0xff]  }
  0xe7   :  { %1551 = vmatpush1.bf16.msra.mxu1 %v2767_v29  ;;  %v2859_v29 = vld [vmem:[%s3807_s3 + $0x164] ss:$8 sps:$4 sm:$0xff]  }
  0xe8   :  { %1552 = vmatprep.subr.bf16.mxu1 %v2772_v30  ;;  %v2857_v30 = vld [vmem:[%s3807_s3 + $0x160] ss:$8 sps:$4 sm:$0xff]  }
  0xeb   :  { %1553 = vmatpush1.bf16.msra.mxu1 %v2770_v33  ;;  %v2865_v33 = vld [vmem:[%s3807_s3 + $0x184] ss:$8 sps:$4 sm:$0xff]  }
  0xec   :  { %1554 = vmatprep.subr.bf16.mxu1 %v2775_v35  ;;  %v2863_v35 = vld [vmem:[%s3807_s3 + $0x180] ss:$8 sps:$4 sm:$0xff]  }
  0xef   :  { %1555 = vmatpush1.bf16.msra.mxu1 %v2773_v38  ;;  %v2871_v38 = vld [vmem:[%s3807_s3 + $0x1a4] ss:$8 sps:$4 sm:$0xff]  }
  0xf0   :  { %1556 = vmatprep.subr.bf16.mxu1 %v2778_v39  ;;  %v2869_v39 = vld [vmem:[%s3807_s3 + $0x1a0] ss:$8 sps:$4 sm:$0xff]  }
  0xf3   :  { %1557 = vmatpush1.bf16.msra.mxu1 %v2776_v41  ;;  %v2872_v41 = vld [vmem:[%s3807_s3 + $0x1b0] ss:$8 sps:$4 sm:$0xff]  }
  0xf4   :  { %1558 = vmatprep.subr.bf16.mxu1 %v2781_v42  ;;  %v2877_v42 = vld [vmem:[%s3807_s3 + $0x1c4] ss:$8 sps:$4 sm:$0xff]  }
  0xf7   :  { %1559 = vmatpush1.bf16.msra.mxu1 %v2779_v43  ;;  %v2875_v43 = vld [vmem:[%s3807_s3 + $0x1c0] ss:$8 sps:$4 sm:$0xff]  }
  0xf8   :  { %1560 = vmatprep.subr.bf16.mxu1 %v2784_v44  ;;  %v2880_v44 = vld [vmem:[%s3807_s3 + $0x1d4] ss:$8 sps:$4 sm:$0xff]  }
  0xfb   :  { %1561 = vmatpush1.bf16.msra.mxu1 %v2782_v45  ;;  %v2878_v45 = vld [vmem:[%s3807_s3 + $0x1d0] ss:$8 sps:$4 sm:$0xff]  }
  0xfc   :  { %1562 = vmatprep.subr.bf16.mxu1 %v2787_v46  ;;  %v2883_v46 = vld [vmem:[%s3807_s3 + $0x1e4] ss:$8 sps:$4 sm:$0xff]  }
  0xff   :  { %1563 = vmatpush1.bf16.msra.mxu1 %v2785_v47  ;;  %v2881_v47 = vld [vmem:[%s3807_s3 + $0x1e0] ss:$8 sps:$4 sm:$0xff]  }
 0x100   :  { %1575 = vmatprep.subr.bf16.mxu1 %v2790_v48  ;;  %v2886_v48 = vld [vmem:[%s3807_s3 + $0x1f4] ss:$8 sps:$4 sm:$0xff]  }
 0x102   :  { %1565 = vmatmul.mubr.bf16.vlgmr.msra.gmra.mrb[4].mxu1 %v3356_v10  ;;  %v3680_v10 = vld [vmem:[%s3808_s2] sm:$0xf] }
 0x103   :  { %1576 = vmatpush1.bf16.msra.mxu1 %v2788_v49  ;;  %1607 = vmatprep.mubr.bf16.mxu1 %v2895_v16  ;;  %v3683_v16 = vsub.s32 1, %v3672_v56  ;;  %v2884_v49 = vld [vmem:[%s3807_s3 + $0x1f0] ss:$8 sps:$4 sm:$0xff]  }
 0x105   :  { %v242_v58 = vrot.slane %v3680_v10, %v3683_v16 }
 0x10e   :  { %2380 = vmatmul.mubr.msk.bf16.vlgmr.msra.gmra.mrb[4].mxu1 %vm1270_vm0, %v3386_v18  ;;  %v238_v18 = vrot.slane %v3680_v10, %v3675_v57 }
 0x115   :  { %v1308_v50 = vpop.f32.mrb[0].mxu1 }
 0x116   :  { %v1310_v52 = vpop.f32.mrb[1].mxu1  ;;  %v1309_v59 = vadd.f32 %v1308_v50, %v238_v18  ;;  %v245_v50 = vsub.s32 2, %v3672_v56 }
 0x117   :  { %v1312_v53 = vpop.f32.mrb[2].mxu1  ;;  %v1311_v60 = vadd.f32 %v1310_v52, %v242_v58  ;;  %v249_v52 = vsub.s32 3, %v3672_v56 }
 0x118   :  { %v1314_v54 = vpop.f32.mrb[3].mxu1  ;;  %v1313_v62 = vadd.f32 %v1312_v53, %v238_v18  ;;  %v246_v53 = vrot.slane %v3680_v10, %v245_v50 }
 0x119   :  { %v1315_v1 = vadd.f32 %v1314_v54, %v242_v58  ;;  %v250_v54 = vrot.slane %v3680_v10, %v249_v52  ;;  %v12_v10 = vstv %s3809_s6 }
 0x11a   :  { %13 = vst [vmem:[#allocation2] sm:$0x1] %v12_v10 }
 0x162   :  { %v1437_v61 = vpop.f32.mrb[0].mxu0 }
 0x163   :  { %v2447_v63 = vadd.f32 %v1437_v61, %v1309_v59  ;;  %v1439_v0 = vpop.f32.mrb[1].mxu0 }
 0x164   :  { %v2449_v2 = vadd.f32 %v1439_v0, %v1311_v60  ;;  %v1441_v3 = vpop.f32.mrb[2].mxu0 }
 0x165   :  { %v1618_v6 = vmul.f32 0.2, %v2447_v63  ;;  %v2451_v7 = vadd.f32 %v1441_v3, %v1313_v62  ;;  %v1443_v8 = vpop.f32.mrb[3].mxu0 }
 0x166   :  { %v1619_v9 = vmul.f32 0.2, %v2449_v2  ;;  %v2453_v5 = vadd.f32 %v1443_v8, %v1315_v1 }
 0x167   :  { %v1622_v11 = vmul.f32 0.2, %v2451_v7  ;;  %v1626_v12 = vmax.f32 %v2447_v63, %v1618_v6 }
 0x168   :  { %v1623_v34 = vmul.f32 0.2, %v2453_v5  ;;  %v1627_v14 = vmax.f32 %v2449_v2, %v1619_v9 }
 0x169   :  { %v1630_v13 = vmax.f32 %v2451_v7, %v1622_v11  ;;  %v1702_v11 = vld [vmem:[%s3810_s4] sm:$0x3] }
 0x16a   :  { %v1631_v15 = vmax.f32 %v2453_v5, %v1623_v34  ;;  %v1707_v34 = vrot.slane %v1702_v11, %v3675_v57 }
 0x16b   :  { %v1634_v4 = vpack.c.bf16 %v1630_v13, %v1626_v12  ;;  %v1711_v12 = vrot.slane %v1702_v11, %v3683_v16 }
 0x16c   :  { %v1635_v17 = vpack.c.bf16 %v1631_v15, %v1627_v14  ;;  %v2128_v14 = vld [vmem:[%s3811_s5] sm:$0x3] }
 0x16e   :  { %2066 = vmatprep.mubr.bf16.mxu0 %v1635_v17 }
 0x16f   :  { %2067 = vmatmul.mubr.bf16.vlgmr.msra.gmra.mrb[4].mxu0 %v1634_v4 }
 0x170   :  { %2078 = vmatpush1.bf16.msra.mxu0 %v2839_v51 }
 0x171   :  { %2079 = vmatprep.subr.bf16.mxu0 %v2844_v19 }
 0x174   :  { %2080 = vmatpush1.bf16.msra.mxu0 %v2842_v20 }
 0x175   :  { %2081 = vmatprep.subr.bf16.mxu0 %v2847_v21 }
 0x178   :  { %2082 = vmatpush1.bf16.msra.mxu0 %v2845_v22  ;;  %v2133_v22 = vrot.slane %v2128_v14, %v3675_v57 }
 0x179   :  { %2083 = vmatprep.subr.bf16.mxu0 %v2850_v23 }
 0x17c   :  { %2084 = vmatpush1.bf16.msra.mxu0 %v2848_v24 }
 0x17d   :  { %2085 = vmatprep.subr.bf16.mxu0 %v2853_v25  ;;  %v2137_v25 = vrot.slane %v2128_v14, %v3683_v16 }
 0x180   :  { %2086 = vmatpush1.bf16.msra.mxu0 %v2851_v26 }
 0x181   :  { %2087 = vmatprep.subr.bf16.mxu0 %v2856_v27 }
 0x184   :  { %2088 = vmatpush1.bf16.msra.mxu0 %v2854_v28 }
 0x185   :  { %2089 = vmatprep.subr.bf16.mxu0 %v2859_v29 }
 0x188   :  { %2090 = vmatpush1.bf16.msra.mxu0 %v2857_v30 }
 0x189   :  { %2091 = vmatprep.subr.bf16.mxu0 %v2862_v31 }
 0x18c   :  { %2092 = vmatpush1.bf16.msra.mxu0 %v2860_v32 }
 0x18d   :  { %2093 = vmatprep.subr.bf16.mxu0 %v2865_v33 }
 0x190   :  { %2094 = vmatpush1.bf16.msra.mxu0 %v2863_v35 }
 0x191   :  { %2095 = vmatprep.subr.bf16.mxu0 %v2868_v36 }
 0x194   :  { %2096 = vmatpush1.bf16.msra.mxu0 %v2866_v37 }
 0x195   :  { %2097 = vmatprep.subr.bf16.mxu0 %v2871_v38 }
 0x198   :  { %2098 = vmatpush1.bf16.msra.mxu0 %v2869_v39  ;;  %v2445_v39 = vld [vmem:[#allocation2] ss:$0 sm:$0xff] }
 0x199   :  { %2099 = vmatprep.subr.bf16.mxu0 %v2874_v40 }
 0x19c   :  { %2100 = vmatpush1.bf16.msra.mxu0 %v2872_v41 }
 0x19d   :  { %2101 = vmatprep.subr.bf16.mxu0 %v2877_v42 }
 0x1a0   :  { %2102 = vmatpush1.bf16.msra.mxu0 %v2875_v43 }
 0x1a1   :  { %2103 = vmatprep.subr.bf16.mxu0 %v2880_v44 }
 0x1a4   :  { %2104 = vmatpush1.bf16.msra.mxu0 %v2878_v45 }
 0x1a5   :  { %2105 = vmatprep.subr.bf16.mxu0 %v2883_v46 }
 0x1a8   :  { %2106 = vmatpush1.bf16.msra.mxu0 %v2881_v47 }
 0x1a9   :  { %2107 = vmatprep.subr.bf16.mxu0 %v2886_v48 }
 0x1ac   :  { %2108 = vmatpush1.bf16.msra.mxu0 %v2884_v49 }
 0x1e1   :  { %v1609_v55 = vpop.f32.mrb[4].mxu1 }
 0x1e2   :  { %v2454_v18 = vadd.f32 %v1609_v55, %v246_v53  ;;  %v1611_v58 = vpop.f32.mrb[5].mxu1 }
 0x1e3   :  { %v2455_v59 = vadd.f32 %v1611_v58, %v250_v54  ;;  %v1613_v60 = vpop.f32.mrb[6].mxu1 }
 0x1e4   :  { %v1620_v61 = vmul.f32 0.2, %v2454_v18  ;;  %v2456_v62 = vadd.f32 %v1613_v60, %v246_v53  ;;  %v1615_v63 = vpop.f32.mrb[7].mxu1 }
 0x1e5   :  { %v1621_v0 = vmul.f32 0.2, %v2455_v59  ;;  %v2457_v1 = vadd.f32 %v1615_v63, %v250_v54 }
 0x1e6   :  { %v1624_v2 = vmul.f32 0.2, %v2456_v62  ;;  %v1628_v6 = vmax.f32 %v2454_v18, %v1620_v61 }
 0x1e7   :  { %v1625_v3 = vmul.f32 0.2, %v2457_v1  ;;  %v1629_v8 = vmax.f32 %v2455_v59, %v1621_v0 }
 0x1e8   :  { %v1632_v7 = vmax.f32 %v2456_v62, %v1624_v2 }
 0x1e9   :  { %v1633_v56 = vmax.f32 %v2457_v1, %v1625_v3 }
 0x1ea   :  { %v1636_v9 = vpack.c.bf16 %v1632_v7, %v1628_v6 }
 0x1eb   :  { %v1637_v5 = vpack.c.bf16 %v1633_v56, %v1629_v8 }
 0x1ed   :  { %2109 = vmatprep.mubr.bf16.mxu0 %v1637_v5 }
 0x1ee   :  { %2110 = vmatmul.mubr.bf16.vlgmr.msra.gmra.mrb[4].mxu0 %v1636_v9 }
 0x2c1   :  { %v2111_v13 = vpop.f32.mrb[4].mxu0 }
 0x2c2   :  { %v2458_v15 = vadd.f32 %v2111_v13, %v1707_v34  ;;  %v2113_v4 = vpop.f32.mrb[5].mxu0 }
 0x2c3   :  { %v2459_v17 = vadd.f32 %v2113_v4, %v1711_v12  ;;  %v2115_v51 = vpop.f32.mrb[6].mxu0 }
 0x2c4   :  { %v2120_v19 = vmul.f32 0.2, %v2458_v15  ;;  %v2460_v20 = vadd.f32 %v2115_v51, %v1707_v34  ;;  %v2117_v21 = vpop.f32.mrb[7].mxu0 }
 0x2c5   :  { %v2121_v23 = vmul.f32 0.2, %v2459_v17  ;;  %v2461_v24 = vadd.f32 %v2117_v21, %v1711_v12 }
 0x2c6   :  { %v2124_v26 = vmax.f32 %v2458_v15, %v2120_v19  ;;  %v2122_v27 = vmul.f32 0.2, %v2460_v20 }
 0x2c7   :  { %v2125_v28 = vmax.f32 %v2459_v17, %v2121_v23  ;;  %v2123_v29 = vmul.f32 0.2, %v2461_v24 }
 0x2c8   :  { %v2126_v30 = vmax.f32 %v2460_v20, %v2122_v27  ;;  %v2140_v31 = vmul.f32 %v2133_v22, %v2124_v26 }
 0x2c9   :  { %v2127_v32 = vmax.f32 %v2461_v24, %v2123_v29  ;;  %v2141_v33 = vmul.f32 %v2137_v25, %v2125_v28 }
 0x2ca   :  { %v2142_v35 = vmul.f32 %v2133_v22, %v2126_v30 }
 0x2cb   :  { %v2144_v36 = vadd.f32 %v2141_v33, %v2140_v31  ;;  %v2143_v37 = vmul.f32 %v2137_v25, %v2127_v32 }
 0x2cd   :  { %2145 = vadd.xlane.f32.xlu0 %v2144_v36  ;;  %v2147_v38 = vadd.f32 %v2143_v37, %v2142_v35 }
 0x2d1   :  { %2148 = vadd.xlane.f32.xlu0 %v2147_v38 }
 0x35a   :  { %v2146_v57 = vpop.xlane.xlu0 %2145 }
 0x35b   :  { %v2157_v40 = vadd.f32 %v2445_v39, %v2146_v57 }
 0x35d   :  { %v2159_v41 = vsub.f32 0.0, %v2157_v40 }
 0x35e   :  { %v2149_v42 = vpop.xlane.xlu0 %2148 }
 0x35f   :  { %v2161_v16 = vmul.f32 1.442695, %v2159_v41  ;;  %v2158_v43 = vadd.f32 %v2445_v39, %v2149_v42 }
 0x361   :  { %2887 = vpow2.f32 %v2161_v16  ;;  %v2160_v44 = vsub.f32 0.0, %v2158_v43 }
 0x363   :  { %v2163_v45 = vmul.f32 1.442695, %v2160_v44 }
 0x365   :  { %2889 = vpow2.f32 %v2163_v45 }
 0x36b   :  { %v2888_v46 = vpop.eup %2887 }
 0x36c   :  { %v2165_v47 = vadd.f32 1.0, %v2888_v46 }
 0x36e   :  { %2891 = vrcp.f32 %v2165_v47 }
 0x36f   :  { %v2890_v48 = vpop.eup %2889 }
 0x370   :  { %v2166_v49 = vadd.f32 1.0, %v2890_v48 }
 0x372   :  { %2893 = vrcp.f32 %v2166_v49 }
 0x378   :  { %v2892_v50 = vpop.eup %2891 }
 0x379   :  { %2170 = vst.msk [vmem:[%s3812_s7] sm:$0xff] %vm2169_vm1, %v2892_v50 }
 0x37c   :  { %v2894_v52 = vpop.eup %2893 }
 0x37d   :  { %2171 = vst.msk [vmem:[%s3812_s7 + $0x8] sm:$0xff] %vm2169_vm1, %v2894_v52 }

</bundles_post_ra>
